<compile_context>
chip_gen: v5e
topology: v5e:2x2
jax: 0.10.0
libtpu: 0.0.40
codegen_flags: <defaults>
</compile_context>

<pallas_src>
import functools

import jax
import jax.numpy as jnp
from jax import lax
from jax.experimental import pallas as pl
from jax.experimental.pallas import tpu as pltpu

HIDDEN = 128
CNN_OUT = 512
VMEM_LIMIT = 32 * 1024 * 1024   # explicit budget: safe headroom on v7x's 64 MiB


def _round_up(x, m):
    return ((x + m - 1) // m) * m


# ----------------------------------------------------------------------------
# Generic row-tiled matmul + bias (+ optional relu / log_softmax)
#   (M, K) @ (K, N) + b ; M tiled ("parallel"), K and N resident per block.
# ----------------------------------------------------------------------------
def _matmul_bias_kernel(x_ref, w_ref, b_ref, o_ref, *, activation):
    y = jnp.dot(x_ref[...], w_ref[...], preferred_element_type=jnp.float32)
    y = y + b_ref[...]
    if activation == "relu":
        y = jnp.maximum(y, 0.0)
    elif activation == "log_softmax":
        m = jnp.max(y, axis=-1, keepdims=True)
        z = y - m
        lse = jnp.log(jnp.sum(jnp.exp(z), axis=-1, keepdims=True))
        y = z - lse
    o_ref[...] = y.astype(o_ref.dtype)


def tiled_matmul_bias(x, w, b, *, activation=None, tm=256):
    """x:(M,K) f32/bf16, w:(K,N) bf16, b:(N,) f32 -> (M,N) f32."""
    M, K = x.shape
    N = w.shape[1]
    tm = min(tm, _round_up(M, 8))
    Mp = _round_up(M, tm)
    xb = x.astype(jnp.bfloat16)
    if Mp != M:
        xb = jnp.pad(xb, ((0, Mp - M), (0, 0)))
    out = pl.pallas_call(
        functools.partial(_matmul_bias_kernel, activation=activation),
        out_shape=jax.ShapeDtypeStruct((Mp, N), jnp.float32),
        grid_spec=pltpu.PrefetchScalarGridSpec(
            num_scalar_prefetch=0,
            grid=(Mp // tm,),
            in_specs=[
                pl.BlockSpec((tm, K), lambda i: (i, 0)),
                pl.BlockSpec((K, N), lambda i: (0, 0)),
                pl.BlockSpec((1, N), lambda i: (0, 0)),
            ],
            out_specs=pl.BlockSpec((tm, N), lambda i: (i, 0)),
        ),
        compiler_params=pltpu.CompilerParams(
            dimension_semantics=("parallel",),
            vmem_limit_bytes=VMEM_LIMIT,
        ),
    )(xb, w.astype(jnp.bfloat16), b.reshape(1, N).astype(jnp.float32))
    return out[:M] if Mp != M else out


# ----------------------------------------------------------------------------
# CNN stand-in: per-width-column projection (H -> 512) + ReLU
# ----------------------------------------------------------------------------
def cnn_forward(img, p):
    """img: (B, 1, Himg, W) NCHW -> sequence (T=W, B, 512), time-major."""
    B, C, Himg, W = img.shape
    assert C == 1
    # rows ordered (w, b) so the flat result is already time-major
    cols = jnp.transpose(img[:, 0], (2, 0, 1)).reshape(W * B, Himg)
    feats = tiled_matmul_bias(cols, p["w_cnn"], p["b_cnn"], activation="relu")
    return feats.reshape(W, B, CNN_OUT)


# ----------------------------------------------------------------------------
# Fused bidirectional LSTM recurrence (single kernel, both directions)
#
# gin:  (T, B, 8H) f32 — precomputed x @ W_ih^T + (b_ih + b_hh), gate columns
#       interleaved as [i_f, i_b, f_f, f_b, g_f, g_b, o_f, o_b].
# wrec: (2H, 8H) bf16  — block-diagonal: rows 0:H (h_fwd) feed fwd gate
#       columns, rows H:2H (h_bwd) feed bwd gate columns.
# Outputs: h_fwd (T, B, H), h_bwd (T, B, H); concatenated outside.
# ----------------------------------------------------------------------------
def _bilstm_rec_kernel(gin_ref, wrec_ref, of_ref, ob_ref, h_sc, c_sc,
                       *, seq_len, hidden):
    H = hidden
    h_sc[...] = jnp.zeros_like(h_sc)
    c_sc[...] = jnp.zeros_like(c_sc)
    lane = lax.broadcasted_iota(jnp.int32, (1, 8 * H), 1)
    fwd_mask = (lane // H) % 2 == 0          # True on fwd-direction gate lanes

    @pl.loop(0, seq_len)
    def _(t):
        rec = jnp.dot(h_sc[...].astype(jnp.bfloat16), wrec_ref[...],
                      preferred_element_type=jnp.float32)           # (B, 8H)
        # fwd direction consumes time t, bwd direction consumes time T-1-t
        gates = jnp.where(fwd_mask, gin_ref[t], gin_ref[seq_len - 1 - t]) + rec
        ii = jax.nn.sigmoid(gates[:, 0 * H:2 * H])    # [i_f | i_b]
        ff = jax.nn.sigmoid(gates[:, 2 * H:4 * H])    # [f_f | f_b]
        gg = jnp.tanh(gates[:, 4 * H:6 * H])          # [g_f | g_b]
        oo = jax.nn.sigmoid(gates[:, 6 * H:8 * H])    # [o_f | o_b]
        c = ff * c_sc[...] + ii * gg                  # (B, 2H) = [c_f | c_b]
        h = oo * jnp.tanh(c)
        c_sc[...] = c
        h_sc[...] = h
        of_ref[t] = h[:, :H]
        ob_ref[seq_len - 1 - t] = h[:, H:]


def bilstm_layer(x, lp):
    """x: (T, B, D) -> (T, B, 2H)."""
    T, B, D = x.shape
    H = HIDDEN
    # Hoisted input projection for BOTH directions: one big bf16 MXU matmul.
    gin = tiled_matmul_bias(x.reshape(T * B, D), lp["w_in"], lp["b_in"])
    gin = gin.reshape(T, B, 8 * H)
    h_f, h_b = pl.pallas_call(
        functools.partial(_bilstm_rec_kernel, seq_len=T, hidden=H),
        out_shape=(jax.ShapeDtypeStruct((T, B, H), jnp.float32),
                   jax.ShapeDtypeStruct((T, B, H), jnp.float32)),
        scratch_shapes=[pltpu.VMEM((B, 2 * H), jnp.float32),   # h state
                        pltpu.VMEM((B, 2 * H), jnp.float32)],  # c state
        compiler_params=pltpu.CompilerParams(vmem_limit_bytes=VMEM_LIMIT),
    )(gin, lp["w_rec"])
    return jnp.concatenate([h_f, h_b], axis=-1)


# ----------------------------------------------------------------------------
# Embedding (Linear 2H -> lexicon, lane-padded) + log_softmax, row-tiled
# ----------------------------------------------------------------------------
def embed_logsoftmax(x, p):
    T, B, D = x.shape
    L = p["lexicon_size"]
    flat = tiled_matmul_bias(x.reshape(T * B, D), p["w_emb"], p["b_emb"],
                             activation="log_softmax")     # (T*B, L_pad)
    return flat[:, :L].reshape(T, B, L)


# ----------------------------------------------------------------------------
# Parameters: raw (PyTorch layouts) + one-time preparation
# ----------------------------------------------------------------------------
def init_raw_params(key, *, img_h, lexicon_size):
    """Random parameters in PyTorch nn.LSTM / nn.Linear layouts."""
    ks = iter(jax.random.split(key, 64))
    scale = 0.05

    def nrm(shape):
        return (scale * jax.random.normal(next(ks), shape)).astype(jnp.float32)

    raw = {
        "w_cnn": nrm((img_h, CNN_OUT)),
        "b_cnn": nrm((CNN_OUT,)),
        "w_emb": nrm((lexicon_size, 2 * HIDDEN)),
        "b_emb": nrm((lexicon_size,)),
        "lstm": [],
    }
    for layer in range(2):
        d_in = CNN_OUT if layer == 0 else 2 * HIDDEN
        lp = {}
        for tag in ("f", "r"):
            lp[f"w_ih_{tag}"] = nrm((4 * HIDDEN, d_in))
            lp[f"w_hh_{tag}"] = nrm((4 * HIDDEN, HIDDEN))
            lp[f"b_ih_{tag}"] = nrm((4 * HIDDEN,))
            lp[f"b_hh_{tag}"] = nrm((4 * HIDDEN,))
        raw["lstm"].append(lp)
    return raw


def _interleave_gates(a_f, a_r, axis):
    """PyTorch gate order (i,f,g,o) per direction -> [i_f,i_b,f_f,f_b,g_f,g_b,o_f,o_b]."""
    fs = jnp.split(a_f, 4, axis=axis)
    rs = jnp.split(a_r, 4, axis=axis)
    parts = []
    for g in range(4):
        parts += [fs[g], rs[g]]
    return jnp.concatenate(parts, axis=axis)


def _block_diag_rec(w_hh_f, w_hh_r):
    """(4H,H) PyTorch W_hh pair -> (2H,8H) block-diag recurrent weight."""
    H = HIDDEN
    wf, wr = w_hh_f.T, w_hh_r.T                     # (H, 4H) each
    z = jnp.zeros((H, H), wf.dtype)
    top, bot = [], []
    for g in range(4):
        top += [wf[:, g * H:(g + 1) * H], z]        # h_fwd -> fwd gate cols
        bot += [z, wr[:, g * H:(g + 1) * H]]        # h_bwd -> bwd gate cols
    return jnp.concatenate([jnp.concatenate(top, axis=1),
                            jnp.concatenate(bot, axis=1)], axis=0)


def prepare_params(raw, lexicon_size):
    """One-time weight prep (do NOT redo per forward call).
    Folds PyTorch's b_ih + b_hh into a single bias (mathematically identical),
    transposes / interleaves gate blocks, pads the lexicon to 128 lanes,
    and casts matmul weights to bf16 (biases and state stay f32)."""
    L_pad = _round_up(lexicon_size, 128)
    p = {
        "w_cnn": raw["w_cnn"].astype(jnp.bfloat16),
        "b_cnn": raw["b_cnn"].astype(jnp.float32),
        "lexicon_size": lexicon_size,
        "lstm": [],
    }
    w_emb_t = raw["w_emb"].T                                     # (2H, L)
    p["w_emb"] = jnp.pad(w_emb_t, ((0, 0), (0, L_pad - lexicon_size))
                         ).astype(jnp.bfloat16)
    p["b_emb"] = jnp.pad(raw["b_emb"].astype(jnp.float32),
                         (0, L_pad - lexicon_size),
                         constant_values=-1e30)                  # mask pads
    for lp in raw["lstm"]:
        w_in = _interleave_gates(lp["w_ih_f"].T, lp["w_ih_r"].T, axis=1)
        b_in = _interleave_gates(lp["b_ih_f"] + lp["b_hh_f"],
                                 lp["b_ih_r"] + lp["b_hh_r"], axis=0)
        w_rec = _block_diag_rec(lp["w_hh_f"], lp["w_hh_r"])
        p["lstm"].append({
            "w_in": w_in.astype(jnp.bfloat16),     # (D_in, 8H)
            "b_in": b_in.astype(jnp.float32),      # (8H,)
            "w_rec": w_rec.astype(jnp.bfloat16),   # (2H, 8H)
        })
    return p


# ----------------------------------------------------------------------------
# Full model forward
# ----------------------------------------------------------------------------
def model_forward(img, params):
    x = cnn_forward(img, params)                 # (T, B, 512)
    x = bilstm_layer(x, params["lstm"][0])       # (T, B, 256)
    # nn.LSTM inter-layer dropout(p=0.2) is train-only -> identity at inference
    x = bilstm_layer(x, params["lstm"][1])       # (T, B, 256)
    return embed_logsoftmax(x, params)           # (T, B, lexicon)


if __name__ == "__main__":
    key = jax.random.PRNGKey(0)
    k_img, k_par = jax.random.split(key)

    B, C, Himg, Wimg = 2, 1, 16, 8      # sequence length T = W = 8
    lexicon_size = 32

    img = jax.random.normal(k_img, (B, C, Himg, Wimg), dtype=jnp.float32)
    raw = init_raw_params(k_par, img_h=Himg, lexicon_size=lexicon_size)
    params = prepare_params(raw, lexicon_size)

    y = jax.block_until_ready(model_forward(img, params))

    assert y.shape == (Wimg, B, lexicon_size), y.shape
    # log_softmax sanity: probabilities along the class axis sum to 1
    probs_sum = jnp.exp(y).sum(axis=2)
    assert jnp.allclose(probs_sum, 1.0, atol=1e-4), probs_sum
    print("KERNEL_OK")
</pallas_src>

<mosaic_0001>
module attributes {stable_mosaic.version = 11 : i64} {
  func.func @_matmul_bias_kernel(%arg0: i32, %arg1: memref<16x16xbf16, #tpu.memory_space<vmem>>, %arg2: memref<16x512xbf16, #tpu.memory_space<vmem>>, %arg3: memref<1x512xf32, #tpu.memory_space<vmem>>, %arg4: memref<16x512xf32, #tpu.memory_space<vmem>>) attributes {dimension_semantics = [#tpu.dimension_semantics<parallel>], iteration_bounds = array<i64: 1>, scalar_prefetch = 0 : i64, scratch_operands = 0 : i64, tpu.core_type = #tpu.core_type<tc>, window_params = [{transform_indices = @transform_0, window_bounds = array<i64: 16, 16>}, {pipeline_mode = #tpu.pipeline_mode<synchronous>, transform_indices = @transform_1, window_bounds = array<i64: 16, 512>}, {pipeline_mode = #tpu.pipeline_mode<synchronous>, transform_indices = @transform_2, window_bounds = array<i64: 1, 512>}, {transform_indices = @transform_3, window_bounds = array<i64: 16, 512>}]} {
    %c0 = arith.constant 0 : index
    %c0_0 = arith.constant 0 : index
    %0 = vector.load %arg1[%c0, %c0_0] : memref<16x16xbf16, #tpu.memory_space<vmem>>, vector<16x16xbf16>
    %c0_1 = arith.constant 0 : index
    %c0_2 = arith.constant 0 : index
    %1 = vector.load %arg2[%c0_1, %c0_2] : memref<16x512xbf16, #tpu.memory_space<vmem>>, vector<16x512xbf16>
    %cst = arith.constant dense<0.000000e+00> : vector<16x512xf32>
    %2 = tpu.matmul %0, %1, %cst {dimension_numbers = #tpu.dot_dimension_numbers<[1], [0], [0], [1], [0, 0, 1, 1], [], []>} : vector<16x16xbf16>, vector<16x512xbf16>, vector<16x512xf32> -> vector<16x512xf32>
    %c0_3 = arith.constant 0 : index
    %c0_4 = arith.constant 0 : index
    %3 = vector.load %arg3[%c0_3, %c0_4] : memref<1x512xf32, #tpu.memory_space<vmem>>, vector<1x512xf32>
    %4 = vector.broadcast %3 : vector<1x512xf32> to vector<16x512xf32>
    %5 = arith.addf %2, %4 : vector<16x512xf32>
    %cst_5 = arith.constant 0.000000e+00 : f32
    %6 = vector.broadcast %cst_5 : f32 to vector<16x512xf32>
    %7 = arith.maximumf %5, %6 : vector<16x512xf32>
    %c0_6 = arith.constant 0 : index
    %c0_7 = arith.constant 0 : index
    %8 = vector.load %arg4[%c0_6, %c0_7] : memref<16x512xf32, #tpu.memory_space<vmem>>, vector<16x512xf32>
    tpu.vector_store %arg4[%c0_6, %c0_7], %7 {strides = array<i32>} : memref<16x512xf32, #tpu.memory_space<vmem>>, vector<16x512xf32>,
    return
  }
  func.func @transform_0(%arg0: i32) -> (i32, i32) {
    %c0_i32 = arith.constant 0 : i32
    %c0_i32_0 = arith.constant 0 : i32
    return %arg0, %c0_i32 : i32, i32
  }
  func.func @transform_1(%arg0: i32) -> (i32, i32) {
    %c0_i32 = arith.constant 0 : i32
    %c0_i32_0 = arith.constant 0 : i32
    %c0_i32_1 = arith.constant 0 : i32
    return %c0_i32, %c0_i32_0 : i32, i32
  }
  func.func @transform_2(%arg0: i32) -> (i32, i32) {
    %c0_i32 = arith.constant 0 : i32
    %c0_i32_0 = arith.constant 0 : i32
    %c0_i32_1 = arith.constant 0 : i32
    return %c0_i32, %c0_i32_0 : i32, i32
  }
  func.func @transform_3(%arg0: i32) -> (i32, i32) {
    %c0_i32 = arith.constant 0 : i32
    %c0_i32_0 = arith.constant 0 : i32
    return %arg0, %c0_i32 : i32, i32
  }
}

</mosaic_0001>

<bundles_post_ra>
// kernel: tpu_custom_call.1
= control target key start
LH: loop header
LB: loop body
LE: loop exit
PB: predicated region body
PF: predicated region fallthrough
CT: control target
= control target key end

     0   :  { %8 = vsyncpa [#allocation3], 0  ;;  %s381_s0 = inlined_call_operand.hbm [shape: bf16[16,16], index: 0, kind: input, shape index: {}]   ;;  %s382_s1 = inlined_call_operand.hbm [shape: bf16[16,512], index: 1, kind: input, shape index: {}]   ;;  %s383_s2 = inlined_call_operand.hbm [shape: f32[1,512], index: 2, kind: input, shape index: {}]   ;;  %s384_s3 = inlined_call_operand.hbm [shape: f32[16,512], index: 3, kind: output, shape index: {}]  }
   0x1   :  { %9 = vsyncpa [#allocation6], 0  ;;  %s28_s14 = sshll.u32 %s382_s1, 4  ;;  %s29_s14 = int_to_ptr.hbm [resolvable:$true] %s28_s14 }
   0x2   :  { %10 = vsyncpa [#allocation4], 0  ;;  %s339_s15 = smov [#allocation5]   ;;  %s15_s19 = sshll.u32 %s381_s0, 4  ;;  %s16_s19 = int_to_ptr.hbm [resolvable:$true] %s15_s19 }
   0x3   :  { %s30_s16 = sshll.u32 %s339_s15, 4  ;;  %s340_s20 = smov 256   ;;  %s31_s16 = int_to_ptr.vmem [resolvable:$true] %s30_s16 }
   0x4   :  { %s341_s21 = smov 16   ;;  %s342_s22 = smov [#allocation2]  }
   0x5   :  { %36 = dma.hbm_to_vmem [thread:$0]  %s29_s14, 512, %s31_s16, [#allocation6], %s340_s20, %s340_s20, %s341_s21  }
   0x6   :  { %s17_s23 = sshll.u32 %s342_s22, 4  ;;  %s343_s24 = smov 64   ;;  %s18_s23 = int_to_ptr.vmem [resolvable:$true] %s17_s23 }
   0x7   :  { %s344_s25 = smov 4   ;;  %s42_s27 = sshll.u32 %s383_s2, 4  ;;  %s43_s27 = int_to_ptr.hbm [resolvable:$true] %s42_s27 }
   0x8   :  { %23 = dma.hbm_to_vmem [thread:$0]  %s16_s19, 128, %s18_s23, [#allocation3], %s343_s24, %s343_s24, %s344_s25  }
   0x9   :  { %s345_s28 = smov [#allocation7]  }
   0xa   :  { %s44_s29 = sshll.u32 %s345_s28, 4  ;;  %s45_s29 = int_to_ptr.vmem [resolvable:$true] %s44_s29 }
   0xb   :  { %47 = dma.hbm_to_vmem [thread:$0]  %s43_s27, 64, %s45_s29, [#allocation6]  }
   0xc   :  { %333 = dma.done.wait [#allocation3], 128  }
   0xd   :  { %334 = vsyncadd [#allocation3], 4294967168 }
   0xe   :  { %335 = dma.done.wait [#allocation6], 576  }
   0xf   :  { %336 = vsyncadd [#allocation6], 4294966720  ;;  %v204_v0 = vld [vmem:[#allocation5] sm:$0xf]  ;;  %v225_v1 = vld [vmem:[#allocation5 + $0xc] sm:$0xf0] }
  0x10   :  { %v223_v2 = vld [vmem:[#allocation5 + $0x4] sm:$0xf]  ;;  %v205_v3 = vor.u32 %v225_v1, %v204_v0  ;;  %v206_v4 = vld [vmem:[#allocation5 + $0x10] sm:$0xf0]  ;;  %v212_v5 = vld [vmem:[#allocation5 + $0x8] sm:$0xf] }
  0x11   :  { %v226_v6 = vld [vmem:[#allocation5 + $0x14] sm:$0xf0]  ;;  %v209_v7 = vor.u32 %v223_v2, %v206_v4  ;;  %v224_v9 = vld [vmem:[#allocation5 + $0xc] sm:$0xf]  ;;  %v214_v10 = vld [vmem:[#allocation5 + $0x18] sm:$0xf0] }
  0x12   :  { %v213_v8 = vor.u32 %v226_v6, %v212_v5  ;;  %v222_v11 = vld [vmem:[#allocation2] sm:$0xff]  ;;  %113 = vmatpush.bf16.msra.mxu0 %v205_v3  ;;  %v217_v12 = vor.u32 %v224_v9, %v214_v10  ;;  %vm102_vm0 = vcmask 130048   ;;  %v67_v13 = vld [vmem:[#allocation7] sm:$0xf]  ;;  %s346_s0 = smov [#allocation8]   ;;  %s184_s5 = sshll.u32 %s384_s3, 4  ;;  %s185_s5 = int_to_ptr.hbm [resolvable:$true] %s184_s5 }
  0x13   :  { %127 = vmatpush.bf16.msra.mxu1 %v209_v7  ;;  %v69_v14 = vperm.slane %v67_v13, 0  ;;  %v70_v15 = vperm.slane %v67_v13, 1  ;;  %v71_v22 = vperm.slane %v67_v13, 2  ;;  %v72_v23 = vperm.slane %v67_v13, 3  ;;  %s182_s2 = sshll.u32 %s346_s0, 4  ;;  %s347_s6 = smov 512   ;;  %s183_s2 = int_to_ptr.vmem [resolvable:$true] %s182_s2 }
  0x14   :  { %141 = vmatpush.bf16.msra.mxu2 %v213_v8  ;;  %155 = vmatpush.bf16.msra.mxu3 %v217_v12  ;;  %s348_s7 = smov 32  }
  0x15   :  { %218 = vmatmul.msk.bf16.vlgmr.msra.gmra.mxu0 %vm102_vm0, %v222_v11 }
  0x16   :  { %219 = vmatmul.msk.bf16.vlgmr.msra.gmra.mxu1 %vm102_vm0, %v222_v11 }
  0x17   :  { %220 = vmatmul.msk.bf16.vlgmr.msra.gmra.mxu2 %vm102_vm0, %v222_v11  ;;  %221 = vmatmul.msk.bf16.vlgmr.msra.gmra.mxu3 %vm102_vm0, %v222_v11 }
  0x92   :  { %v115_v16 = vpop.f32.mrf.mxu0 }
  0x93   :  { %v116_v17 = vadd.f32 %v115_v16, %v69_v14  ;;  %v129_v18 = vpop.f32.mrf.mxu1 }
  0x94   :  { %v130_v19 = vadd.f32 %v129_v18, %v70_v15 }
  0x95   :  { %v162_v20 = vmax.f32 %v116_v17, 0.0 }
  0x96   :  { %v163_v21 = vmax.f32 %v130_v19, 0.0 }
  0x97   :  { %170 = vst [vmem:[#allocation8] sm:$0xff] %v162_v20 }
  0x98   :  { %171 = vst [vmem:[#allocation8 + $0x8] sm:$0xff] %v163_v21 }
  0x9a   :  { %v143_v24 = vpop.f32.mrf.mxu2  ;;  %v157_v26 = vpop.f32.mrf.mxu3 }
  0x9b   :  { %v144_v25 = vadd.f32 %v143_v24, %v71_v22  ;;  %v117_v27 = vpop.f32.mrf.mxu0  ;;  %v158_v28 = vadd.f32 %v157_v26, %v72_v23  ;;  %v131_v30 = vpop.f32.mrf.mxu1 }
  0x9c   :  { %v118_v29 = vadd.f32 %v117_v27, %v69_v14  ;;  %v132_v32 = vadd.f32 %v131_v30, %v70_v15 }
  0x9d   :  { %v164_v31 = vmax.f32 %v144_v25, 0.0  ;;  %v165_v33 = vmax.f32 %v158_v28, 0.0 }
  0x9e   :  { %v166_v34 = vmax.f32 %v118_v29, 0.0  ;;  %v167_v35 = vmax.f32 %v132_v32, 0.0 }
  0x9f   :  { %172 = vst [vmem:[#allocation8 + $0x10] sm:$0xff] %v164_v31 }
  0xa0   :  { %173 = vst [vmem:[#allocation8 + $0x18] sm:$0xff] %v165_v33 }
  0xa1   :  { %174 = vst [vmem:[#allocation8 + $0x20] sm:$0xff] %v166_v34 }
  0xa2   :  { %175 = vst [vmem:[#allocation8 + $0x28] sm:$0xff] %v167_v35  ;;  %v145_v36 = vpop.f32.mrf.mxu2  ;;  %v159_v38 = vpop.f32.mrf.mxu3 }
  0xa3   :  { %v146_v37 = vadd.f32 %v145_v36, %v71_v22  ;;  %v160_v39 = vadd.f32 %v159_v38, %v72_v23 }
  0xa5   :  { %v168_v40 = vmax.f32 %v146_v37, 0.0  ;;  %v169_v41 = vmax.f32 %v160_v39, 0.0 }
  0xa7   :  { %176 = vst [vmem:[#allocation8 + $0x30] sm:$0xff] %v168_v40 }
  0xa8   :  { %177 = vst [vmem:[#allocation8 + $0x38] sm:$0xff] %v169_v41 }
  0xa9   :  { %190 = dma.vmem_to_hbm [thread:$0]  %s183_s2, 1024, %s185_s5, [#allocation4], %s347_s6, %s347_s6, %s348_s7  }
  0xaa   :  { %337 = dma.done.wait [#allocation4], 1024  }
  0xab   :  { %338 = vsyncadd [#allocation4], 4294966272 }
  0xac   :  { %195 = vsyncpa [#allocation3], 1 }
  0xad   :  { %196 = vsyncpa [#allocation6], 1 }
  0xae   :  { %197 = vsyncpa [#allocation4], 1 }

</bundles_post_ra>
